<compile_context>
chip_gen: v5e
topology: v5e:2x2
jax: 0.10.0
libtpu: 0.0.40
codegen_flags: <defaults>
</compile_context>

<pallas_src>
import jax
import jax.numpy as jnp
from jax.experimental import pallas as pl
from jax.experimental.pallas import tpu as pltpu


def ffn_kernel(x_ref, w1_ref, b1_ref, w2_ref, b2_ref, g_ref, beta_ref, o_ref):
    # x_ref: (tm, D)   w1_ref: (D, F) bf16   b1_ref: (1, F) f32
    # w2_ref: (F, D) bf16   b2_ref/g_ref/beta_ref: (1, D) f32
    x_f32 = x_ref[...].astype(jnp.float32)           # residual / LN path (f32)
    x_mxu = x_ref[...].astype(jnp.bfloat16)          # MXU operand (bf16)

    # hidden = relu(x @ W1 + b1)  -- bf16 operands, f32 accumulation
    h = jnp.dot(x_mxu, w1_ref[...], preferred_element_type=jnp.float32)
    h = jnp.maximum(h + b1_ref[...], 0.0)

    # y = h @ W2 + b2 + residual  -- bf16 operands, f32 accumulation
    y = jnp.dot(h.astype(jnp.bfloat16), w2_ref[...],
                preferred_element_type=jnp.float32)
    # TODO(synk): dropout omitted (inference semantics -> identity)
    y = y + b2_ref[...] + x_f32

    # One-pass LayerNorm over model_dim (eps matches nn.LayerNorm default
    # 1e-5): accumulate E[y] and E[y^2] together, var = E[y^2] - mean^2.
    inv_d = 1.0 / y.shape[-1]
    mean = jnp.sum(y, axis=-1, keepdims=True) * inv_d
    mean_sq = jnp.sum(y * y, axis=-1, keepdims=True) * inv_d
    var = jnp.maximum(mean_sq - mean * mean, 0.0)
    y_norm = (y - mean) * jax.lax.rsqrt(var + 1e-5)
    o_ref[...] = (y_norm * g_ref[...] + beta_ref[...]).astype(o_ref.dtype)


def _round_up(x, m):
    return ((x + m - 1) // m) * m


def _choose_tile_and_pad(M, tm_req):
    """Row tile (multiple of 8, <= tm_req) and padded row count (multiple of tm)."""
    tm = max(8, min(_round_up(tm_req, 8), _round_up(M, 8)))
    m_pad = _round_up(M, tm)
    return tm, m_pad


def positional_wise_ffn(x, w1, b1, w2, b2, gamma, beta, *, tm=512):
    """x: (B, S, D); w1: (D, F); b1: (F,); w2: (F, D); b2,gamma,beta: (D,)."""
    B, S, D = x.shape
    F_ = w1.shape[1]
    M = B * S
    tm, m_pad = _choose_tile_and_pad(M, tm)

    x2 = x.reshape(M, D)
    if m_pad != M:
        x2 = jnp.pad(x2, ((0, m_pad - M), (0, 0)))

    # Weights in bf16 for MXU + halved HBM/VMEM footprint; biases/LN in f32.
    w1_bf = w1.astype(jnp.bfloat16)
    w2_bf = w2.astype(jnp.bfloat16)
    b1_2 = b1.reshape(1, F_).astype(jnp.float32)
    b2_2 = b2.reshape(1, D).astype(jnp.float32)
    g_2 = gamma.reshape(1, D).astype(jnp.float32)
    be_2 = beta.reshape(1, D).astype(jnp.float32)

    single = pl.Buffered(1)  # invariant operands: no dead second VMEM buffer

    out = pl.pallas_call(
        ffn_kernel,
        out_shape=jax.ShapeDtypeStruct((m_pad, D), x.dtype),
        grid_spec=pltpu.PrefetchScalarGridSpec(
            num_scalar_prefetch=0,
            grid=(m_pad // tm,),
            in_specs=[
                pl.BlockSpec((tm, D), lambda i: (i, 0)),   # x tile (pipelined)
                pl.BlockSpec((D, F_), lambda i: (0, 0), pipeline_mode=single),
                pl.BlockSpec((1, F_), lambda i: (0, 0), pipeline_mode=single),
                pl.BlockSpec((F_, D), lambda i: (0, 0), pipeline_mode=single),
                pl.BlockSpec((1, D), lambda i: (0, 0), pipeline_mode=single),
                pl.BlockSpec((1, D), lambda i: (0, 0), pipeline_mode=single),
                pl.BlockSpec((1, D), lambda i: (0, 0), pipeline_mode=single),
            ],
            out_specs=pl.BlockSpec((tm, D), lambda i: (i, 0)),
        ),
        compiler_params=pltpu.CompilerParams(
            dimension_semantics=("parallel",),   # v7x: shard rows over 2 TCs
            vmem_limit_bytes=48 * 1024 * 1024,   # headroom below v7x 64 MiB/TC
        ),
    )(x2, w1_bf, b1_2, w2_bf, b2_2, g_2, be_2)

    if m_pad != M:
        out = out[:M]
    return out.reshape(B, S, D)


def reference_ffn_bf16(x, w1, b1, w2, b2, gamma, beta):
    """Pure-JAX reference with the same bf16-operand / f32-accumulate matmuls."""
    h = jnp.dot(x.astype(jnp.bfloat16), w1.astype(jnp.bfloat16),
                preferred_element_type=jnp.float32) + b1
    h = jnp.maximum(h, 0.0)
    y = jnp.dot(h.astype(jnp.bfloat16), w2.astype(jnp.bfloat16),
                preferred_element_type=jnp.float32) + b2 + x
    mean = jnp.mean(y, axis=-1, keepdims=True)
    var = jnp.mean((y - mean) ** 2, axis=-1, keepdims=True)
    return (y - mean) * jax.lax.rsqrt(var + 1e-5) * gamma + beta


if __name__ == "__main__":
    # Small shapes consistent with the module: batch=2, seq=8,
    # model_dim=32, ffn_dim=64 (defaults 768/2048 scaled down for the demo;
    # real shapes are multiples of 128 and therefore lane-dense).
    B, S, D, F_ = 2, 8, 32, 64
    key = jax.random.PRNGKey(0)
    kx, kw1, kb1, kw2, kb2 = jax.random.split(key, 5)

    x = jax.random.normal(kx, (B, S, D), dtype=jnp.float32)
    # Deterministic parameter init (synthetic; mimics Linear fan-in scaling).
    w1 = jax.random.normal(kw1, (D, F_), dtype=jnp.float32) * (1.0 / jnp.sqrt(D))
    b1 = jax.random.normal(kb1, (F_,), dtype=jnp.float32) * 0.01
    w2 = jax.random.normal(kw2, (F_, D), dtype=jnp.float32) * (1.0 / jnp.sqrt(F_))
    b2 = jax.random.normal(kb2, (D,), dtype=jnp.float32) * 0.01
    gamma = jnp.ones((D,), dtype=jnp.float32)
    beta = jnp.zeros((D,), dtype=jnp.float32)

    out = positional_wise_ffn(x, w1, b1, w2, b2, gamma, beta)
    out = jax.block_until_ready(out)

    ref = reference_ffn_bf16(x, w1, b1, w2, b2, gamma, beta)
    assert out.shape == (B, S, D)
    assert jnp.allclose(out, ref, atol=1e-2, rtol=1e-2), (
        float(jnp.max(jnp.abs(out - ref))))
    print("KERNEL_OK")
</pallas_src>

<mosaic_0001>
module attributes {stable_mosaic.version = 11 : i64} {
  func.func @ffn_kernel(%arg0: i32, %arg1: memref<16x32xf32, #tpu.memory_space<vmem>>, %arg2: memref<32x64xbf16, #tpu.memory_space<vmem>>, %arg3: memref<1x64xf32, #tpu.memory_space<vmem>>, %arg4: memref<64x32xbf16, #tpu.memory_space<vmem>>, %arg5: memref<1x32xf32, #tpu.memory_space<vmem>>, %arg6: memref<1x32xf32, #tpu.memory_space<vmem>>, %arg7: memref<1x32xf32, #tpu.memory_space<vmem>>, %arg8: memref<16x32xf32, #tpu.memory_space<vmem>>) attributes {dimension_semantics = [#tpu.dimension_semantics<parallel>], iteration_bounds = array<i64: 1>, scalar_prefetch = 0 : i64, scratch_operands = 0 : i64, tpu.core_type = #tpu.core_type<tc>, window_params = [{transform_indices = @transform_0, window_bounds = array<i64: 16, 32>}, {pipeline_mode = #tpu.pipeline_mode<synchronous>, transform_indices = @transform_1, window_bounds = array<i64: 32, 64>}, {pipeline_mode = #tpu.pipeline_mode<synchronous>, transform_indices = @transform_2, window_bounds = array<i64: 1, 64>}, {pipeline_mode = #tpu.pipeline_mode<synchronous>, transform_indices = @transform_3, window_bounds = array<i64: 64, 32>}, {pipeline_mode = #tpu.pipeline_mode<synchronous>, transform_indices = @transform_4, window_bounds = array<i64: 1, 32>}, {pipeline_mode = #tpu.pipeline_mode<synchronous>, transform_indices = @transform_5, window_bounds = array<i64: 1, 32>}, {pipeline_mode = #tpu.pipeline_mode<synchronous>, transform_indices = @transform_6, window_bounds = array<i64: 1, 32>}, {transform_indices = @transform_7, window_bounds = array<i64: 16, 32>}]} {
    %c0 = arith.constant 0 : index
    %c0_0 = arith.constant 0 : index
    %0 = vector.load %arg1[%c0, %c0_0] : memref<16x32xf32, #tpu.memory_space<vmem>>, vector<16x32xf32>
    %c0_1 = arith.constant 0 : index
    %c0_2 = arith.constant 0 : index
    %1 = vector.load %arg1[%c0_1, %c0_2] : memref<16x32xf32, #tpu.memory_space<vmem>>, vector<16x32xf32>
    %2 = arith.truncf %1 : vector<16x32xf32> to vector<16x32xbf16>
    %c0_3 = arith.constant 0 : index
    %c0_4 = arith.constant 0 : index
    %3 = vector.load %arg2[%c0_3, %c0_4] : memref<32x64xbf16, #tpu.memory_space<vmem>>, vector<32x64xbf16>
    %cst = arith.constant dense<0.000000e+00> : vector<16x64xf32>
    %4 = tpu.matmul %2, %3, %cst {dimension_numbers = #tpu.dot_dimension_numbers<[1], [0], [0], [1], [0, 0, 1, 1], [], []>} : vector<16x32xbf16>, vector<32x64xbf16>, vector<16x64xf32> -> vector<16x64xf32>
    %c0_5 = arith.constant 0 : index
    %c0_6 = arith.constant 0 : index
    %5 = vector.load %arg3[%c0_5, %c0_6] : memref<1x64xf32, #tpu.memory_space<vmem>>, vector<1x64xf32>
    %6 = vector.broadcast %5 : vector<1x64xf32> to vector<16x64xf32>
    %7 = arith.addf %4, %6 : vector<16x64xf32>
    %cst_7 = arith.constant 0.000000e+00 : f32
    %8 = vector.broadcast %cst_7 : f32 to vector<16x64xf32>
    %9 = arith.maximumf %7, %8 : vector<16x64xf32>
    %10 = arith.truncf %9 : vector<16x64xf32> to vector<16x64xbf16>
    %c0_8 = arith.constant 0 : index
    %c0_9 = arith.constant 0 : index
    %11 = vector.load %arg4[%c0_8, %c0_9] : memref<64x32xbf16, #tpu.memory_space<vmem>>, vector<64x32xbf16>
    %cst_10 = arith.constant dense<0.000000e+00> : vector<16x32xf32>
    %12 = tpu.matmul %10, %11, %cst_10 {dimension_numbers = #tpu.dot_dimension_numbers<[1], [0], [0], [1], [0, 0, 1, 1], [], []>} : vector<16x64xbf16>, vector<64x32xbf16>, vector<16x32xf32> -> vector<16x32xf32>
    %c0_11 = arith.constant 0 : index
    %c0_12 = arith.constant 0 : index
    %13 = vector.load %arg5[%c0_11, %c0_12] : memref<1x32xf32, #tpu.memory_space<vmem>>, vector<1x32xf32>
    %14 = vector.broadcast %13 : vector<1x32xf32> to vector<16x32xf32>
    %15 = arith.addf %12, %14 : vector<16x32xf32>
    %16 = arith.addf %15, %0 : vector<16x32xf32>
    %cst_13 = arith.constant dense<0.000000e+00> : vector<16xf32>
    %17 = vector.multi_reduction <add>, %16, %cst_13 [1] : vector<16x32xf32> to vector<16xf32>
    %18 = vector.shape_cast %17 : vector<16xf32> to vector<16x1xf32>
    %cst_14 = arith.constant 3.125000e-02 : f32
    %19 = vector.broadcast %cst_14 : f32 to vector<16x1xf32>
    %20 = arith.mulf %18, %19 : vector<16x1xf32>
    %21 = arith.mulf %16, %16 : vector<16x32xf32>
    %cst_15 = arith.constant dense<0.000000e+00> : vector<16xf32>
    %22 = vector.multi_reduction <add>, %21, %cst_15 [1] : vector<16x32xf32> to vector<16xf32>
    %23 = vector.shape_cast %22 : vector<16xf32> to vector<16x1xf32>
    %cst_16 = arith.constant 3.125000e-02 : f32
    %24 = vector.broadcast %cst_16 : f32 to vector<16x1xf32>
    %25 = arith.mulf %23, %24 : vector<16x1xf32>
    %26 = arith.mulf %20, %20 : vector<16x1xf32>
    %27 = arith.subf %25, %26 : vector<16x1xf32>
    %cst_17 = arith.constant 0.000000e+00 : f32
    %28 = vector.broadcast %cst_17 : f32 to vector<16x1xf32>
    %29 = arith.maximumf %27, %28 : vector<16x1xf32>
    %30 = vector.broadcast %20 : vector<16x1xf32> to vector<16x32xf32>
    %31 = arith.subf %16, %30 : vector<16x32xf32>
    %cst_18 = arith.constant 9.99999974E-6 : f32
    %32 = vector.broadcast %cst_18 : f32 to vector<16x1xf32>
    %33 = arith.addf %29, %32 : vector<16x1xf32>
    %34 = math.rsqrt %33 : vector<16x1xf32>
    %35 = vector.broadcast %34 : vector<16x1xf32> to vector<16x32xf32>
    %36 = arith.mulf %31, %35 : vector<16x32xf32>
    %c0_19 = arith.constant 0 : index
    %c0_20 = arith.constant 0 : index
    %37 = vector.load %arg6[%c0_19, %c0_20] : memref<1x32xf32, #tpu.memory_space<vmem>>, vector<1x32xf32>
    %38 = vector.broadcast %37 : vector<1x32xf32> to vector<16x32xf32>
    %39 = arith.mulf %36, %38 : vector<16x32xf32>
    %c0_21 = arith.constant 0 : index
    %c0_22 = arith.constant 0 : index
    %40 = vector.load %arg7[%c0_21, %c0_22] : memref<1x32xf32, #tpu.memory_space<vmem>>, vector<1x32xf32>
    %41 = vector.broadcast %40 : vector<1x32xf32> to vector<16x32xf32>
    %42 = arith.addf %39, %41 : vector<16x32xf32>
    %c0_23 = arith.constant 0 : index
    %c0_24 = arith.constant 0 : index
    %43 = vector.load %arg8[%c0_23, %c0_24] : memref<16x32xf32, #tpu.memory_space<vmem>>, vector<16x32xf32>
    tpu.vector_store %arg8[%c0_23, %c0_24], %42 {strides = array<i32>} : memref<16x32xf32, #tpu.memory_space<vmem>>, vector<16x32xf32>,
    return
  }
  func.func @transform_0(%arg0: i32) -> (i32, i32) {
    %c0_i32 = arith.constant 0 : i32
    %c0_i32_0 = arith.constant 0 : i32
    return %arg0, %c0_i32 : i32, i32
  }
  func.func @transform_1(%arg0: i32) -> (i32, i32) {
    %c0_i32 = arith.constant 0 : i32
    %c0_i32_0 = arith.constant 0 : i32
    %c0_i32_1 = arith.constant 0 : i32
    return %c0_i32, %c0_i32_0 : i32, i32
  }
  func.func @transform_2(%arg0: i32) -> (i32, i32) {
    %c0_i32 = arith.constant 0 : i32
    %c0_i32_0 = arith.constant 0 : i32
    %c0_i32_1 = arith.constant 0 : i32
    return %c0_i32, %c0_i32_0 : i32, i32
  }
  func.func @transform_3(%arg0: i32) -> (i32, i32) {
    %c0_i32 = arith.constant 0 : i32
    %c0_i32_0 = arith.constant 0 : i32
    %c0_i32_1 = arith.constant 0 : i32
    return %c0_i32, %c0_i32_0 : i32, i32
  }
  func.func @transform_4(%arg0: i32) -> (i32, i32) {
    %c0_i32 = arith.constant 0 : i32
    %c0_i32_0 = arith.constant 0 : i32
    %c0_i32_1 = arith.constant 0 : i32
    return %c0_i32, %c0_i32_0 : i32, i32
  }
  func.func @transform_5(%arg0: i32) -> (i32, i32) {
    %c0_i32 = arith.constant 0 : i32
    %c0_i32_0 = arith.constant 0 : i32
    %c0_i32_1 = arith.constant 0 : i32
    return %c0_i32, %c0_i32_0 : i32, i32
  }
  func.func @transform_6(%arg0: i32) -> (i32, i32) {
    %c0_i32 = arith.constant 0 : i32
    %c0_i32_0 = arith.constant 0 : i32
    %c0_i32_1 = arith.constant 0 : i32
    return %c0_i32, %c0_i32_0 : i32, i32
  }
  func.func @transform_7(%arg0: i32) -> (i32, i32) {
    %c0_i32 = arith.constant 0 : i32
    %c0_i32_0 = arith.constant 0 : i32
    return %arg0, %c0_i32 : i32, i32
  }
}

</mosaic_0001>

<bundles_post_ra>
// kernel: tpu_custom_call.1
= control target key start
LH: loop header
LB: loop body
LE: loop exit
PB: predicated region body
PF: predicated region fallthrough
CT: control target
= control target key end

     0   :  { %s368_s0 = inlined_call_operand.vmem [shape: f32[16,32], index: 0, kind: input, shape index: {}]   ;;  %s369_s1 = inlined_call_operand.vmem [shape: bf16[32,64], index: 1, kind: input, shape index: {}]   ;;  %s370_s2 = inlined_call_operand.vmem [shape: f32[1,64], index: 2, kind: input, shape index: {}]   ;;  %s371_s3 = inlined_call_operand.vmem [shape: bf16[64,32], index: 3, kind: input, shape index: {}]   ;;  %s372_s4 = inlined_call_operand.vmem [shape: f32[1,32], index: 4, kind: input, shape index: {}]   ;;  %s373_s5 = inlined_call_operand.vmem [shape: f32[1,32], index: 5, kind: input, shape index: {}]   ;;  %s374_s6 = inlined_call_operand.vmem [shape: f32[1,32], index: 6, kind: input, shape index: {}]   ;;  %s375_s7 = inlined_call_operand.hbm [shape: f32[16,32], index: 7, kind: output, shape index: {}]  }
   0x1   :  { %v237_v0 = vld [vmem:[%s369_s1 + $0x8] sm:$0xff]  ;;  %v236_v1 = vld [vmem:[%s369_s1] sm:$0xff] }
   0x2   :  { %v28_v2 = vld [vmem:[%s368_s0] sm:$0xff]  ;;  %v29_v3 = vld [vmem:[%s368_s0 + $0x8] sm:$0xff]  ;;  %61 = vmatpush.bf16.msra.mxu0 %v237_v0 }
   0x3   :  { %12 = vsyncpa [#allocation3], 0  ;;  %v30_v4 = vpack.c.bf16 %v29_v3, %v28_v2  ;;  %vm51_vm0 = vcmask 261120   ;;  %v241_v5 = vld [vmem:[%s371_s3 + $0x18] sm:$0xff]  ;;  %v240_v6 = vld [vmem:[%s371_s3 + $0x10] sm:$0xff]  ;;  %vm108_vm1 = vcmask 523264  }
   0x4   :  { %116 = vmatpush.bf16.msra.mxu1 %v241_v5  ;;  %v239_v7 = vld [vmem:[%s371_s3 + $0x8] sm:$0xff]  ;;  %v238_v8 = vld [vmem:[%s371_s3] sm:$0xff]  ;;  %s198_s23 = sshll.u32 %s375_s7, 4  ;;  %s281_s24 = smov 8   ;;  %s199_s23 = int_to_ptr.hbm [resolvable:$true] %s198_s23 }
   0x5   :  { %v245_v10 = vld [vmem:[%s370_s2] ss:$0 sm:$0xff] }
   0x6   :  { %62 = vmatpush.bf16.msra.mxu0 %v236_v1  ;;  %v246_v17 = vld [vmem:[%s372_s4] ss:$0 sm:$0xff] }
   0x7   :  { %v247_v54 = vld [vmem:[%s373_s5] ss:$0 sm:$0xff]  ;;  %s279_s5 = smov [#allocation2]  }
   0x8   :  { %117 = vmatpush.bf16.msra.mxu1 %v240_v6  ;;  %v248_v59 = vld [vmem:[%s374_s6] ss:$0 sm:$0xff]  ;;  %s196_s20 = sshll.u32 %s279_s5, 4  ;;  %s280_s6 = smov 128   ;;  %s197_s20 = int_to_ptr.vmem [resolvable:$true] %s196_s20 }
   0x9   :  { %218 = vmatmul.msk.bf16.vlgmr.msra.gmra.mxu0 %vm51_vm0, %v30_v4 }
   0xc   :  { %118 = vmatpush.bf16.msra.mxu1 %v239_v7 }
  0x10   :  { %119 = vmatpush.bf16.msra.mxu1 %v238_v8 }
  0x86   :  { %v64_v9 = vpop.f32.mrf.mxu0 }
  0x87   :  { %v65_v11 = vadd.f32 %v245_v10, %v64_v9 }
  0x89   :  { %v69_v14 = vmax.f32 %v65_v11, 0.0 }
  0x8e   :  { %v66_v12 = vpop.f32.mrf.mxu0 }
  0x8f   :  { %v67_v13 = vadd.f32 %v245_v10, %v66_v12 }
  0x91   :  { %v70_v15 = vmax.f32 %v67_v13, 0.0 }
  0x93   :  { %v71_v16 = vpack.c.bf16 %v70_v15, %v69_v14 }
  0x95   :  { %235 = vmatmul.msk.bf16.vlgmr.msra.gmra.mxu1 %vm108_vm1, %v71_v16 }
 0x112   :  { %v121_v18 = vpop.f32.mrf.mxu1 }
 0x113   :  { %v122_v19 = vadd.f32 %v246_v17, %v121_v18 }
 0x115   :  { %v126_v20 = vadd.f32 %v122_v19, %v28_v2 }
 0x117   :  { %v128_v21 = vsel %vm51_vm0, %v126_v20, 0.0  ;;  %v136_v22 = vmul.f32 %v126_v20, %v126_v20 }
 0x118   :  { %129 = vadd.xlane.f32.xlu0 %v128_v21 }
 0x119   :  { %v138_v23 = vsel %vm51_vm0, %v136_v22, 0.0 }
 0x11a   :  { %v123_v24 = vpop.f32.mrf.mxu1  ;;  %139 = vadd.xlane.f32.xlu1 %v138_v23 }
 0x11b   :  { %v124_v25 = vadd.f32 %v246_v17, %v123_v24 }
 0x11d   :  { %v127_v26 = vadd.f32 %v124_v25, %v29_v3 }
 0x11f   :  { %v131_v27 = vsel %vm51_vm0, %v127_v26, 0.0  ;;  %v137_v28 = vmul.f32 %v127_v26, %v127_v26 }
 0x120   :  { %132 = vadd.xlane.f32.xlu0 %v131_v27 }
 0x121   :  { %v141_v29 = vsel %vm51_vm0, %v137_v28, 0.0 }
 0x122   :  { %142 = vadd.xlane.f32.xlu1 %v141_v29 }
 0x18b   :  { %v130_v30 = vpop.xlane.xlu0 %129 }
 0x18c   :  { %v134_v31 = vmul.f32 0.03125, %v130_v30 }
 0x18d   :  { %v140_v32 = vpop.xlane.xlu1 %139 }
 0x18e   :  { %v146_v33 = vmul.f32 %v134_v31, %v134_v31  ;;  %v144_v34 = vmul.f32 0.03125, %v140_v32  ;;  %v152_v53 = vsub.f32 %v126_v20, %v134_v31 }
 0x190   :  { %v148_v35 = vsub.f32 %v144_v34, %v146_v33 }
 0x192   :  { %v150_v36 = vmax.f32 %v148_v35, 0.0 }
 0x193   :  { %v133_v37 = vpop.xlane.xlu0 %132 }
 0x194   :  { %v154_v38 = vadd.f32 1e-05, %v150_v36  ;;  %v135_v39 = vmul.f32 0.03125, %v133_v37 }
 0x195   :  { %v143_v40 = vpop.xlane.xlu1 %142 }
 0x196   :  { %249 = vrsqrt.f32 %v154_v38  ;;  %v147_v41 = vmul.f32 %v135_v39, %v135_v39  ;;  %v145_v42 = vmul.f32 0.03125, %v143_v40  ;;  %vm162_vm3 = vweird.f32 %v154_v38 }
 0x197   :  { %v153_v1 = vsub.f32 %v127_v26, %v135_v39 }
 0x198   :  { %v149_v43 = vsub.f32 %v145_v42, %v147_v41 }
 0x19a   :  { %v151_v44 = vmax.f32 %v149_v43, 0.0 }
 0x19c   :  { %v250_v45 = vpop.eup %249  ;;  %v155_v47 = vadd.f32 1e-05, %v151_v44 }
 0x19d   :  { %v157_v46 = vmul.f32 %v250_v45, %v154_v38  ;;  %vm163_vm2 = vweird.f32 %v250_v45 }
 0x19e   :  { %251 = vrsqrt.f32 %v155_v47  ;;  %vm164_vm4 = vmor %vm162_vm3, %vm163_vm2  ;;  %vm172_vm6 = vweird.f32 %v155_v47 }
 0x19f   :  { %v158_v48 = vmul.f32 %v250_v45, %v157_v46 }
 0x1a1   :  { %v159_v49 = vmul.f32 0.5, %v158_v48 }
 0x1a3   :  { %v160_v50 = vsub.f32 1.5, %v159_v49 }
 0x1a4   :  { %v252_v51 = vpop.eup %251 }
 0x1a5   :  { %v161_v52 = vmul.f32 %v250_v45, %v160_v50  ;;  %v167_v55 = vmul.f32 %v252_v51, %v155_v47  ;;  %vm173_vm5 = vweird.f32 %v252_v51 }
 0x1a6   :  { %vm174_vm7 = vmor %vm172_vm6, %vm173_vm5 }
 0x1a7   :  { %v165_v56 = vsel %vm164_vm4, %v250_v45, %v161_v52  ;;  %v168_v58 = vmul.f32 %v252_v51, %v167_v55 }
 0x1a8   :  { %v176_v57 = vmul.f32 %v165_v56, %v152_v53 }
 0x1a9   :  { %v169_v61 = vmul.f32 0.5, %v168_v58 }
 0x1aa   :  { %v182_v60 = vmul.f32 %v247_v54, %v176_v57 }
 0x1ab   :  { %v170_v62 = vsub.f32 1.5, %v169_v61 }
 0x1ac   :  { %v188_v63 = vadd.f32 %v248_v59, %v182_v60 }
 0x1ad   :  { %v171_v0 = vmul.f32 %v252_v51, %v170_v62 }
 0x1ae   :  { %190 = vst.msk [vmem:[#allocation2] sm:$0xff] %vm51_vm0, %v188_v63 }
 0x1af   :  { %v175_v2 = vsel %vm174_vm7, %v252_v51, %v171_v0 }
 0x1b0   :  { %v177_v3 = vmul.f32 %v175_v2, %v153_v1 }
 0x1b2   :  { %v183_v4 = vmul.f32 %v247_v54, %v177_v3 }
 0x1b4   :  { %v189_v5 = vadd.f32 %v248_v59, %v183_v4 }
 0x1b6   :  { %191 = vst.msk [vmem:[#allocation2 + $0x8] sm:$0xff] %vm51_vm0, %v189_v5 }
 0x1b7   :  { %204 = dma.vmem_to_hbm [thread:$0]  %s197_s20, 256, %s199_s23, [#allocation3], %s280_s6, %s280_s6, %s281_s24  }
 0x1b8   :  { %277 = dma.done.wait [#allocation3], 256  }
 0x1b9   :  { %278 = vsyncadd [#allocation3], 4294967040 }
 0x1ba   :  { %209 = vsyncpa [#allocation3], 1 }

</bundles_post_ra>
